<compile_context>
chip_gen: v5e
topology: v5e:2x2
jax: 0.10.0
libtpu: 0.0.40
codegen_flags: <defaults>
</compile_context>

<pallas_src>
import functools

import jax
import jax.numpy as jnp
from jax.experimental import pallas as pl
from jax.experimental.pallas import tpu as pltpu

IN_FEATURES = 2048
LANE = 128


# ----------------------------- Pallas kernel ------------------------------- #
def _linear_kernel(x_ref, w_ref, b_ref, o_ref):
    # x_ref: (B, K) f32, w_ref: (K, Np) bf16, b_ref: (1, Np) f32, o_ref: (B, Np) f32
    # TODO(synk): this f32->bf16 cast should move into the backbone epilogue
    # (producer emits bf16 features, halving the activation DMA); a standalone
    # wrapper-side cast would just be another un-hidden XLA op, so it stays here.
    x_bf = x_ref[...].astype(jnp.bfloat16)                     # bf16 MXU operand
    acc = jnp.dot(x_bf, w_ref[...], preferred_element_type=jnp.float32)
    o_ref[...] = acc + b_ref[...]                              # f32 bias add (VPU)


def linear_pallas(x, w_t_bf16, b2d, num_class):
    """out = (x @ w_t + b)[:, :num_class] via a single whole-array Pallas call.

    x        : (B, K)   float32   (backbone feature, flattened)
    w_t_bf16 : (K, Np)  bfloat16  (pre-transposed, pre-cast, lane-padded at init)
    b2d      : (1, Np)  float32   (zero-padded past num_class)
    """
    B, K = x.shape
    Np = w_t_bf16.shape[1]

    cost = pl.CostEstimate(
        flops=2 * B * K * Np,
        transcendentals=0,
        bytes_accessed=(
            x.size * x.dtype.itemsize
            + w_t_bf16.size * w_t_bf16.dtype.itemsize
            + b2d.size * b2d.dtype.itemsize
            + B * Np * 4
        ),
    )

    out = pl.pallas_call(
        _linear_kernel,
        out_shape=jax.ShapeDtypeStruct((B, Np), jnp.float32),
        in_specs=[
            pl.BlockSpec(memory_space=pltpu.MemorySpace.VMEM),
            pl.BlockSpec(memory_space=pltpu.MemorySpace.VMEM),
            pl.BlockSpec(memory_space=pltpu.MemorySpace.VMEM),
        ],
        out_specs=pl.BlockSpec(memory_space=pltpu.MemorySpace.VMEM),
        cost_estimate=cost,
    )(x, w_t_bf16, b2d)

    return out[:, :num_class]


# ------------------------------ Net params --------------------------------- #
def init_net_params(num_class, key):
    """fc head: Linear(2048, num_class, bias=True), stored in kernel layout.

    Weight is stored pre-transposed as (K, Np) bf16 and bias as (1, Np) f32
    with Np = num_class rounded up to a multiple of 128, so the per-call path
    does no transpose / pad / cast of the weight and all DMAs / stores are
    lane-dense.
    """
    n_pad = ((num_class + LANE - 1) // LANE) * LANE
    k_w, k_b = jax.random.split(key)
    bound = 1.0 / jnp.sqrt(IN_FEATURES)
    # PyTorch layout is (out, in); transpose + cast + pad once at init.
    w = jax.random.uniform(
        k_w, (num_class, IN_FEATURES), jnp.float32, -bound, bound
    )
    b = jax.random.uniform(k_b, (num_class,), jnp.float32, -bound, bound)

    w_t = jnp.zeros((IN_FEATURES, n_pad), jnp.bfloat16)
    w_t = w_t.at[:, :num_class].set(w.T.astype(jnp.bfloat16))
    b2d = jnp.zeros((1, n_pad), jnp.float32)
    b2d = b2d.at[0, :num_class].set(b)

    return {
        "fc_w_t": w_t,   # (2048, 128) bf16, zero-padded columns
        "fc_b": b2d,     # (1, 128)    f32, zero-padded
    }


# ------------------------------ Net forward -------------------------------- #
@functools.partial(jax.jit, static_argnames=("num_class",))
def net_forward(params, backbone_feature, num_class):
    """Net.forward given the EADNet backbone output.

    backbone_feature : (B, 2048, 1, 1) float32  (what `self.f(...)` returns)
    returns          : (B, num_class)  float32
    """
    B = backbone_feature.shape[0]
    feature = backbone_feature.reshape(B, -1)        # torch.flatten(x, 1)
    return linear_pallas(feature, params["fc_w_t"], params["fc_b"], num_class)


# --------------------------------- main ------------------------------------ #
if __name__ == "__main__":
    num_class = 10
    batch = 2

    key = jax.random.PRNGKey(0)
    k_param, k_feat = jax.random.split(key)

    params = init_net_params(num_class, k_param)

    # TODO(synk): EADNet backbone is undefined in the reference; feed a
    # deterministic synthetic (B, 2048, 1, 1) feature in its place.
    backbone_feature = jax.random.normal(k_feat, (batch, 2048, 1, 1), jnp.float32)

    out = net_forward(params, backbone_feature, num_class)
    out = jax.block_until_ready(out)

    # Reference with the same bf16-rounded operands and f32 accumulation.
    feat = backbone_feature.reshape(batch, -1)
    ref_full = (
        feat.astype(jnp.bfloat16).astype(jnp.float32)
        @ params["fc_w_t"].astype(jnp.float32)
        + params["fc_b"]
    )
    ref = ref_full[:, :num_class]

    assert out.shape == (batch, num_class)
    assert jnp.allclose(out, ref, atol=1e-3, rtol=1e-3)

    print("KERNEL_OK")
</pallas_src>

<mosaic_0001>
module attributes {stable_mosaic.version = 11 : i64} {
  func.func @_linear_kernel(%arg0: memref<2x2048xf32, #tpu.memory_space<vmem>>, %arg1: memref<2048x128xbf16, #tpu.memory_space<vmem>>, %arg2: memref<1x128xf32, #tpu.memory_space<vmem>>, %arg3: memref<2x128xf32, #tpu.memory_space<vmem>>) attributes {dimension_semantics = [], scalar_prefetch = 0 : i64, scratch_operands = 0 : i64, tpu.core_type = #tpu.core_type<tc>} {
    %c0 = arith.constant 0 : index
    %c0_0 = arith.constant 0 : index
    %0 = vector.load %arg0[%c0, %c0_0] : memref<2x2048xf32, #tpu.memory_space<vmem>>, vector<2x2048xf32>
    %1 = arith.truncf %0 : vector<2x2048xf32> to vector<2x2048xbf16>
    %c0_1 = arith.constant 0 : index
    %c0_2 = arith.constant 0 : index
    %2 = vector.load %arg1[%c0_1, %c0_2] : memref<2048x128xbf16, #tpu.memory_space<vmem>>, vector<2048x128xbf16>
    %cst = arith.constant dense<0.000000e+00> : vector<2x128xf32>
    %3 = tpu.matmul %1, %2, %cst {dimension_numbers = #tpu.dot_dimension_numbers<[1], [0], [0], [1], [0, 0, 1, 1], [], []>} : vector<2x2048xbf16>, vector<2048x128xbf16>, vector<2x128xf32> -> vector<2x128xf32>
    %c0_3 = arith.constant 0 : index
    %c0_4 = arith.constant 0 : index
    %4 = vector.load %arg2[%c0_3, %c0_4] : memref<1x128xf32, #tpu.memory_space<vmem>>, vector<1x128xf32>
    %5 = vector.broadcast %4 : vector<1x128xf32> to vector<2x128xf32>
    %6 = arith.addf %3, %5 : vector<2x128xf32>
    %c0_5 = arith.constant 0 : index
    %c0_6 = arith.constant 0 : index
    %7 = vector.load %arg3[%c0_5, %c0_6] : memref<2x128xf32, #tpu.memory_space<vmem>>, vector<2x128xf32>
    tpu.vector_store %arg3[%c0_5, %c0_6], %6 {strides = array<i32>} : memref<2x128xf32, #tpu.memory_space<vmem>>, vector<2x128xf32>,
    return
  }
}

</mosaic_0001>

<bundles_post_ra>
// kernel: net_forward.1
= control target key start
LH: loop header
LB: loop body
LE: loop exit
PB: predicated region body
PF: predicated region fallthrough
CT: control target
= control target key end

     0   :  { %8 = vsyncpa [#allocation3], 0  ;;  %s2104_s0 = inlined_call_operand.vmem [shape: f32[2,2048], index: 0, kind: input, shape index: {}]   ;;  %s2105_s1 = inlined_call_operand.hbm [shape: bf16[2048,128], index: 1, kind: input, shape index: {}]   ;;  %s2106_s2 = inlined_call_operand.vmem [shape: f32[1,128], index: 2, kind: input, shape index: {}]   ;;  %s2107_s3 = inlined_call_operand.hbm [shape: f32[2,128], index: 3, kind: output, shape index: {}]  }
   0x1   :  { %9 = vsyncpa [#allocation4], 0  ;;  %s16_s14 = sshll.u32 %s2105_s1, 4  ;;  %s2043_s15 = smov [#allocation2]   ;;  %s17_s14 = int_to_ptr.hbm [resolvable:$true] %s16_s14 }
   0x2   :  { %s18_s16 = sshll.u32 %s2043_s15, 4  ;;  %s2044_s17 = smov 64   ;;  %s19_s16 = int_to_ptr.vmem [resolvable:$true] %s18_s16 }
   0x3   :  { %s2045_s18 = smov 4  }
   0x4   :  { %24 = dma.hbm_to_vmem [thread:$0]  %s17_s14, 16384, %s19_s16, [#allocation3], %s2044_s17, %s2044_s17, %s2045_s18  }
   0x5   :  { %2039 = dma.done.wait [#allocation3], 16384  }
   0x6   :  { %2040 = vsyncadd [#allocation3], 4294950912  ;;  %v1865_v0 = vld [vmem:[#allocation2 + $0x38] sm:$0xff]  ;;  %v1864_v4 = vld [vmem:[#allocation2 + $0x30] sm:$0xff]  ;;  %s1336_s30 = sshll.u32 %s2107_s3, 4  ;;  %s1337_s30 = int_to_ptr.hbm [resolvable:$true] %s1336_s30 }
   0x7   :  { %v1873_v1 = vld [vmem:[#allocation2 + $0x78] sm:$0xff]  ;;  %1120 = vmatpush.bf16.msra.mxu0 %v1865_v0  ;;  %v1872_v5 = vld [vmem:[#allocation2 + $0x70] sm:$0xff]  ;;  %v1863_v8 = vld [vmem:[#allocation2 + $0x28] sm:$0xff] }
   0x8   :  { %v1881_v2 = vld [vmem:[#allocation2 + $0xb8] sm:$0xff]  ;;  %1133 = vmatpush.bf16.msra.mxu1 %v1873_v1  ;;  %v1880_v6 = vld [vmem:[#allocation2 + $0xb0] sm:$0xff]  ;;  %v1871_v9 = vld [vmem:[#allocation2 + $0x68] sm:$0xff] }
   0x9   :  { %v1889_v3 = vld [vmem:[#allocation2 + $0xf8] sm:$0xff]  ;;  %1146 = vmatpush.bf16.msra.mxu2 %v1881_v2  ;;  %v1888_v7 = vld [vmem:[#allocation2 + $0xf0] sm:$0xff]  ;;  %v1879_v10 = vld [vmem:[#allocation2 + $0xa8] sm:$0xff] }
   0xa   :  { %1159 = vmatpush.bf16.msra.mxu3 %v1889_v3  ;;  %v1887_v11 = vld [vmem:[#allocation2 + $0xe8] sm:$0xff]  ;;  %v1862_v12 = vld [vmem:[#allocation2 + $0x20] sm:$0xff]  ;;  %v1861_v16 = vld [vmem:[#allocation2 + $0x18] sm:$0xff] }
   0xb   :  { %1121 = vmatpush.bf16.msra.mxu0 %v1864_v4  ;;  %v1870_v13 = vld [vmem:[#allocation2 + $0x60] sm:$0xff]  ;;  %v1869_v17 = vld [vmem:[#allocation2 + $0x58] sm:$0xff]  ;;  %v1860_v21 = vld [vmem:[#allocation2 + $0x10] sm:$0xff] }
   0xc   :  { %1134 = vmatpush.bf16.msra.mxu1 %v1872_v5  ;;  %v1878_v14 = vld [vmem:[#allocation2 + $0xa0] sm:$0xff]  ;;  %v1877_v18 = vld [vmem:[#allocation2 + $0x98] sm:$0xff]  ;;  %v1868_v22 = vld [vmem:[#allocation2 + $0x50] sm:$0xff] }
   0xd   :  { %1147 = vmatpush.bf16.msra.mxu2 %v1880_v6  ;;  %v1886_v15 = vld [vmem:[#allocation2 + $0xe0] sm:$0xff]  ;;  %v1885_v19 = vld [vmem:[#allocation2 + $0xd8] sm:$0xff]  ;;  %v1876_v23 = vld [vmem:[#allocation2 + $0x90] sm:$0xff] }
   0xe   :  { %1160 = vmatpush.bf16.msra.mxu3 %v1888_v7  ;;  %v31_v20 = vld [vmem:[%s2104_s0] sm:$0xff]  ;;  %v1884_v24 = vld [vmem:[#allocation2 + $0xd0] sm:$0xff]  ;;  %v1859_v25 = vld [vmem:[#allocation2 + $0x8] sm:$0xff] }
   0xf   :  { %1122 = vmatpush.bf16.msra.mxu0 %v1863_v8  ;;  %39 = vst [vmem:[#allocation1] ss:$4 sm:$0xff] %v31_v20  ;;  %v1867_v26 = vld [vmem:[#allocation2 + $0x48] sm:$0xff]  ;;  %v1858_v29 = vld [vmem:[#allocation2] sm:$0xff]  ;;  %v1897_v38 = vld [vmem:[#allocation2 + $0x138] sm:$0xff] }
  0x10   :  { %1135 = vmatpush.bf16.msra.mxu1 %v1871_v9  ;;  %v1875_v27 = vld [vmem:[#allocation2 + $0x88] sm:$0xff]  ;;  %v1866_v30 = vld [vmem:[#allocation2 + $0x40] sm:$0xff]  ;;  %v1905_v39 = vld [vmem:[#allocation2 + $0x178] sm:$0xff] }
  0x11   :  { %1148 = vmatpush.bf16.msra.mxu2 %v1879_v10  ;;  %v1883_v28 = vld [vmem:[#allocation2 + $0xc8] sm:$0xff]  ;;  %v1874_v36 = vld [vmem:[#allocation2 + $0x80] sm:$0xff]  ;;  %v1913_v40 = vld [vmem:[#allocation2 + $0x1b8] sm:$0xff] }
  0x12   :  { %1161 = vmatpush.bf16.msra.mxu3 %v1887_v11  ;;  %v33_v31 = vld [vmem:[%s2104_s0 + $0x10] sm:$0xff]  ;;  %v1882_v37 = vld [vmem:[#allocation2 + $0xc0] sm:$0xff]  ;;  %v1921_v41 = vld [vmem:[#allocation2 + $0x1f8] sm:$0xff] }
  0x13   :  { %1123 = vmatpush.bf16.msra.mxu0 %v1862_v12  ;;  %v32_v42 = vld [vmem:[%s2104_s0 + $0x8] sm:$0xff]  ;;  %v1896_v47 = vld [vmem:[#allocation2 + $0x130] sm:$0xff]  ;;  %v1895_v51 = vld [vmem:[#allocation2 + $0x128] sm:$0xff] }
  0x14   :  { %1136 = vmatpush.bf16.msra.mxu1 %v1870_v13  ;;  %41 = vst [vmem:[#allocation1 + $0x20] ss:$4 sm:$0xff] %v32_v42  ;;  %v1904_v48 = vld [vmem:[#allocation2 + $0x170] sm:$0xff]  ;;  %v1903_v52 = vld [vmem:[#allocation2 + $0x168] sm:$0xff]  ;;  %v1894_v60 = vld [vmem:[#allocation2 + $0x120] sm:$0xff] }
  0x15   :  { %1149 = vmatpush.bf16.msra.mxu2 %v1878_v14  ;;  %v1912_v49 = vld [vmem:[#allocation2 + $0x1b0] sm:$0xff]  ;;  %v1911_v53 = vld [vmem:[#allocation2 + $0x1a8] sm:$0xff]  ;;  %v1902_v61 = vld [vmem:[#allocation2 + $0x160] sm:$0xff] }
  0x16   :  { %1162 = vmatpush.bf16.msra.mxu3 %v1886_v15  ;;  %v44_v32 = vld.sshfl [vmem:[#allocation1 + $0x10] sm:$0xff pattern:$0x73625140]  ;;  %v42_v33 = vld.sshfl [vmem:[#allocation1] sm:$0xff pattern:$0x73625140] }
  0x17   :  { %1124 = vmatpush.bf16.msra.mxu0 %v1861_v16  ;;  %v45_v34 = vld.sshfl [vmem:[#allocation1 + $0x18] sm:$0xff pattern:$0x73625140]  ;;  %v43_v35 = vld.sshfl [vmem:[#allocation1 + $0x8] sm:$0xff pattern:$0x73625140]  ;;  %v78_v43 = vpack.c.bf16 %v44_v32, %v44_v32  ;;  %v76_v44 = vpack.c.bf16 %v42_v33, %v42_v33 }
  0x18   :  { %1137 = vmatpush.bf16.msra.mxu1 %v1869_v17  ;;  %50 = vst [vmem:[#allocation1] ss:$4 sm:$0xff] %v33_v31  ;;  %v79_v45 = vpack.c.bf16 %v45_v34, %v45_v34  ;;  %v77_v46 = vpack.c.bf16 %v43_v35, %v43_v35  ;;  %v1920_v50 = vld [vmem:[#allocation2 + $0x1f0] sm:$0xff]  ;;  %v1919_v54 = vld [vmem:[#allocation2 + $0x1e8] sm:$0xff]  ;;  %v1910_v62 = vld [vmem:[#allocation2 + $0x1a0] sm:$0xff] }
  0x19   :  { %1150 = vmatpush.bf16.msra.mxu2 %v1877_v18  ;;  %v34_v58 = vld [vmem:[%s2104_s0 + $0x18] sm:$0xff]  ;;  %v1918_v63 = vld [vmem:[#allocation2 + $0x1e0] sm:$0xff]  ;;  %v1893_v0 = vld [vmem:[#allocation2 + $0x118] sm:$0xff] }
  0x1a   :  { %1163 = vmatpush.bf16.msra.mxu3 %v1885_v19  ;;  %v1901_v1 = vld [vmem:[#allocation2 + $0x158] sm:$0xff]  ;;  %v1892_v4 = vld [vmem:[#allocation2 + $0x110] sm:$0xff]  ;;  %v1891_v8 = vld [vmem:[#allocation2 + $0x108] sm:$0xff] }
  0x1b   :  { %1125 = vmatpush.bf16.msra.mxu0 %v1860_v21  ;;  %v2079_v55 = vld.sshfl [vmem:[#allocation1 + $0x30] sm:$0xff pattern:$0x73625140]  ;;  %v2081_v56 = vld.sshfl [vmem:[#allocation1 + $0x20] sm:$0xff pattern:$0x73625140] }
  0x1c   :  { %1138 = vmatpush.bf16.msra.mxu1 %v1868_v22  ;;  %v2083_v57 = vld.sshfl [vmem:[#allocation1 + $0x38] sm:$0xff pattern:$0x73625140]  ;;  %v2088_v59 = vld.sshfl [vmem:[#allocation1 + $0x28] sm:$0xff pattern:$0x73625140]  ;;  %v82_v20 = vpack.c.bf16 %v2079_v55, %v2079_v55  ;;  %v80_v21 = vpack.c.bf16 %v2081_v56, %v2081_v56 }
  0x1d   :  { %1151 = vmatpush.bf16.msra.mxu2 %v1876_v23  ;;  %51 = vst [vmem:[#allocation1 + $0x20] ss:$4 sm:$0xff] %v34_v58  ;;  %v1909_v2 = vld [vmem:[#allocation2 + $0x198] sm:$0xff]  ;;  %v1900_v5 = vld [vmem:[#allocation2 + $0x150] sm:$0xff]  ;;  %v1899_v9 = vld [vmem:[#allocation2 + $0x148] sm:$0xff]  ;;  %v83_v22 = vpack.c.bf16 %v2083_v57, %v2083_v57  ;;  %v81_v23 = vpack.c.bf16 %v2088_v59, %v2088_v59 }
  0x1e   :  { %1164 = vmatpush.bf16.msra.mxu3 %v1884_v24  ;;  %v1917_v3 = vld [vmem:[#allocation2 + $0x1d8] sm:$0xff]  ;;  %v1908_v6 = vld [vmem:[#allocation2 + $0x190] sm:$0xff]  ;;  %v1907_v10 = vld [vmem:[#allocation2 + $0x188] sm:$0xff] }
  0x1f   :  { %1126 = vmatpush.bf16.msra.mxu0 %v1859_v25  ;;  %v1916_v7 = vld [vmem:[#allocation2 + $0x1d0] sm:$0xff]  ;;  %v1915_v11 = vld [vmem:[#allocation2 + $0x1c8] sm:$0xff]  ;;  %v1890_v12 = vld [vmem:[#allocation2 + $0x100] sm:$0xff] }
  0x20   :  { %1139 = vmatpush.bf16.msra.mxu1 %v1867_v26  ;;  %v1898_v13 = vld [vmem:[#allocation2 + $0x140] sm:$0xff]  ;;  %v1929_v16 = vld [vmem:[#allocation2 + $0x238] sm:$0xff]  ;;  %v1928_v24 = vld [vmem:[#allocation2 + $0x230] sm:$0xff] }
  0x21   :  { %1152 = vmatpush.bf16.msra.mxu2 %v1875_v27  ;;  %v1906_v14 = vld [vmem:[#allocation2 + $0x180] sm:$0xff]  ;;  %v1937_v17 = vld [vmem:[#allocation2 + $0x278] sm:$0xff]  ;;  %v1936_v25 = vld [vmem:[#allocation2 + $0x270] sm:$0xff] }
  0x22   :  { %1165 = vmatpush.bf16.msra.mxu3 %v1883_v28  ;;  %v1914_v15 = vld [vmem:[#allocation2 + $0x1c0] sm:$0xff]  ;;  %v1945_v18 = vld [vmem:[#allocation2 + $0x2b8] sm:$0xff]  ;;  %v1944_v26 = vld [vmem:[#allocation2 + $0x2b0] sm:$0xff] }
  0x23   :  { %1127 = vmatpush.bf16.msra.mxu0 %v1858_v29  ;;  %v1953_v19 = vld [vmem:[#allocation2 + $0x2f8] sm:$0xff]  ;;  %v1952_v27 = vld [vmem:[#allocation2 + $0x2f0] sm:$0xff]  ;;  %v1927_v28 = vld [vmem:[#allocation2 + $0x228] sm:$0xff] }
  0x24   :  { %1140 = vmatpush.bf16.msra.mxu1 %v1866_v30  ;;  %v1935_v29 = vld [vmem:[#allocation2 + $0x268] sm:$0xff]  ;;  %v1926_v32 = vld [vmem:[#allocation2 + $0x220] sm:$0xff]  ;;  %v1940_v42 = vld [vmem:[#allocation2 + $0x290] sm:$0xff] }
  0x25   :  { %1153 = vmatpush.bf16.msra.mxu2 %v1874_v36  ;;  %v1943_v30 = vld [vmem:[#allocation2 + $0x2a8] sm:$0xff]  ;;  %v1934_v33 = vld [vmem:[#allocation2 + $0x260] sm:$0xff]  ;;  %v1925_v36 = vld [vmem:[#allocation2 + $0x218] sm:$0xff] }
  0x26   :  { %1166 = vmatpush.bf16.msra.mxu3 %v1882_v37  ;;  %1128 = vmatmul.bf16.vlgmr.msra.gmra.mxu0 %v76_v44  ;;  %v1951_v31 = vld [vmem:[#allocation2 + $0x2e8] sm:$0xff]  ;;  %v1942_v34 = vld [vmem:[#allocation2 + $0x2a0] sm:$0xff]  ;;  %v1933_v37 = vld [vmem:[#allocation2 + $0x258] sm:$0xff] }
  0x27   :  { %1172 = vmatpush.bf16.msrb.mxu0 %v1897_v38  ;;  %1141 = vmatmul.bf16.vlgmr.msra.gmra.mxu1 %v77_v46  ;;  %v1950_v35 = vld [vmem:[#allocation2 + $0x2e0] sm:$0xff]  ;;  %v1941_v38 = vld [vmem:[#allocation2 + $0x298] sm:$0xff]  ;;  %v1923_v44 = vld [vmem:[#allocation2 + $0x208] sm:$0xff] }
  0x28   :  { %1185 = vmatpush.bf16.msrb.mxu1 %v1905_v39  ;;  %1154 = vmatmul.bf16.vlgmr.msra.gmra.mxu2 %v78_v43  ;;  %v1949_v39 = vld [vmem:[#allocation2 + $0x2d8] sm:$0xff]  ;;  %v1948_v43 = vld [vmem:[#allocation2 + $0x2d0] sm:$0xff]  ;;  %v1939_v46 = vld [vmem:[#allocation2 + $0x288] sm:$0xff] }
  0x29   :  { %1198 = vmatpush.bf16.msrb.mxu2 %v1913_v40  ;;  %1167 = vmatmul.bf16.vlgmr.msra.gmra.mxu3 %v79_v45  ;;  %v1924_v40 = vld [vmem:[#allocation2 + $0x210] sm:$0xff]  ;;  %v1931_v45 = vld [vmem:[#allocation2 + $0x248] sm:$0xff]  ;;  %v53_v56 = vld.sshfl [vmem:[#allocation1 + $0x8] sm:$0xff pattern:$0x73625140] }
  0x2a   :  { %1211 = vmatpush.bf16.msrb.mxu3 %v1921_v41  ;;  %v1932_v41 = vld [vmem:[#allocation2 + $0x250] sm:$0xff]  ;;  %v54_v55 = vld.sshfl [vmem:[#allocation1 + $0x10] sm:$0xff pattern:$0x73625140]  ;;  %v1977_v58 = vld [vmem:[#allocation2 + $0x3b8] sm:$0xff] }
  0x2b   :  { %1173 = vmatpush.bf16.msrb.mxu0 %v1896_v47  ;;  %v1947_v47 = vld [vmem:[#allocation2 + $0x2c8] sm:$0xff]  ;;  %v55_v57 = vld.sshfl [vmem:[#allocation1 + $0x18] sm:$0xff pattern:$0x73625140]  ;;  %v1985_v59 = vld [vmem:[#allocation2 + $0x3f8] sm:$0xff] }
  0x2c   :  { %1186 = vmatpush.bf16.msrb.mxu1 %v1904_v48  ;;  %v1922_v48 = vld [vmem:[#allocation2 + $0x200] sm:$0xff] }
  0x2d   :  { %1199 = vmatpush.bf16.msrb.mxu2 %v1912_v49  ;;  %v1930_v49 = vld [vmem:[#allocation2 + $0x240] sm:$0xff] }
  0x2e   :  { %1212 = vmatpush.bf16.msrb.mxu3 %v1920_v50  ;;  %v1938_v50 = vld [vmem:[#allocation2 + $0x280] sm:$0xff] }
  0x2f   :  { %1174 = vmatpush.bf16.msrb.mxu0 %v1895_v51  ;;  %v1946_v51 = vld [vmem:[#allocation2 + $0x2c0] sm:$0xff] }
  0x30   :  { %1187 = vmatpush.bf16.msrb.mxu1 %v1903_v52  ;;  %v1961_v52 = vld [vmem:[#allocation2 + $0x338] sm:$0xff] }
  0x31   :  { %1200 = vmatpush.bf16.msrb.mxu2 %v1911_v53  ;;  %v1969_v53 = vld [vmem:[#allocation2 + $0x378] sm:$0xff] }
  0x32   :  { %1213 = vmatpush.bf16.msrb.mxu3 %v1919_v54  ;;  %v52_v54 = vld.sshfl [vmem:[#allocation1] sm:$0xff pattern:$0x73625140] }
  0x33   :  { %1175 = vmatpush.bf16.msrb.mxu0 %v1894_v60  ;;  %v84_v60 = vpack.c.bf16 %v52_v54, %v52_v54 }
  0x34   :  { %1188 = vmatpush.bf16.msrb.mxu1 %v1902_v61  ;;  %v86_v61 = vpack.c.bf16 %v54_v55, %v54_v55 }
  0x35   :  { %1201 = vmatpush.bf16.msrb.mxu2 %v1910_v62  ;;  %v85_v62 = vpack.c.bf16 %v53_v56, %v53_v56 }
  0x36   :  { %1214 = vmatpush.bf16.msrb.mxu3 %v1918_v63  ;;  %v87_v63 = vpack.c.bf16 %v55_v57, %v55_v57 }
  0x37   :  { %1176 = vmatpush.bf16.msrb.mxu0 %v1893_v0  ;;  %v1960_v0 = vld [vmem:[#allocation2 + $0x330] sm:$0xff] }
  0x38   :  { %1189 = vmatpush.bf16.msrb.mxu1 %v1901_v1  ;;  %v1968_v1 = vld [vmem:[#allocation2 + $0x370] sm:$0xff] }
  0x39   :  { %1202 = vmatpush.bf16.msrb.mxu2 %v1909_v2  ;;  %v1976_v2 = vld [vmem:[#allocation2 + $0x3b0] sm:$0xff] }
  0x3a   :  { %1215 = vmatpush.bf16.msrb.mxu3 %v1917_v3  ;;  %v1984_v3 = vld [vmem:[#allocation2 + $0x3f0] sm:$0xff] }
  0x3b   :  { %1177 = vmatpush.bf16.msrb.mxu0 %v1892_v4  ;;  %v1959_v4 = vld [vmem:[#allocation2 + $0x328] sm:$0xff] }
  0x3c   :  { %1190 = vmatpush.bf16.msrb.mxu1 %v1900_v5  ;;  %v1967_v5 = vld [vmem:[#allocation2 + $0x368] sm:$0xff] }
  0x3d   :  { %1203 = vmatpush.bf16.msrb.mxu2 %v1908_v6  ;;  %v1975_v6 = vld [vmem:[#allocation2 + $0x3a8] sm:$0xff] }
  0x3e   :  { %1216 = vmatpush.bf16.msrb.mxu3 %v1916_v7  ;;  %v1983_v7 = vld [vmem:[#allocation2 + $0x3e8] sm:$0xff] }
  0x3f   :  { %1178 = vmatpush.bf16.msrb.mxu0 %v1891_v8  ;;  %v1958_v8 = vld [vmem:[#allocation2 + $0x320] sm:$0xff] }
  0x40   :  { %1191 = vmatpush.bf16.msrb.mxu1 %v1899_v9  ;;  %v1966_v9 = vld [vmem:[#allocation2 + $0x360] sm:$0xff] }
  0x41   :  { %1204 = vmatpush.bf16.msrb.mxu2 %v1907_v10  ;;  %v1974_v10 = vld [vmem:[#allocation2 + $0x3a0] sm:$0xff] }
  0x42   :  { %1217 = vmatpush.bf16.msrb.mxu3 %v1915_v11  ;;  %v1982_v11 = vld [vmem:[#allocation2 + $0x3e0] sm:$0xff] }
  0x43   :  { %1179 = vmatpush.bf16.msrb.mxu0 %v1890_v12  ;;  %v1957_v12 = vld [vmem:[#allocation2 + $0x318] sm:$0xff] }
  0x44   :  { %1192 = vmatpush.bf16.msrb.mxu1 %v1898_v13  ;;  %v1965_v13 = vld [vmem:[#allocation2 + $0x358] sm:$0xff] }
  0x45   :  { %1205 = vmatpush.bf16.msrb.mxu2 %v1906_v14  ;;  %v1973_v14 = vld [vmem:[#allocation2 + $0x398] sm:$0xff] }
  0x46   :  { %1218 = vmatpush.bf16.msrb.mxu3 %v1914_v15  ;;  %1180 = vmatmul.bf16.vlgmr.msrb.gmra.mxu0 %v80_v21  ;;  %v1981_v15 = vld [vmem:[#allocation2 + $0x3d8] sm:$0xff]  ;;  %v1963_v21 = vld [vmem:[#allocation2 + $0x348] sm:$0xff] }
  0x47   :  { %1224 = vmatpush.bf16.msra.mxu0 %v1929_v16  ;;  %1193 = vmatmul.bf16.vlgmr.msrb.gmra.mxu1 %v81_v23  ;;  %v1956_v16 = vld [vmem:[#allocation2 + $0x310] sm:$0xff]  ;;  %v1979_v23 = vld [vmem:[#allocation2 + $0x3c8] sm:$0xff] }
  0x48   :  { %1237 = vmatpush.bf16.msra.mxu1 %v1937_v17  ;;  %1206 = vmatmul.bf16.vlgmr.msrb.gmra.mxu2 %v82_v20  ;;  %v1964_v17 = vld [vmem:[#allocation2 + $0x350] sm:$0xff]  ;;  %v1955_v20 = vld [vmem:[#allocation2 + $0x308] sm:$0xff] }
  0x49   :  { %1250 = vmatpush.bf16.msra.mxu2 %v1945_v18  ;;  %1219 = vmatmul.bf16.vlgmr.msrb.gmra.mxu3 %v83_v22  ;;  %v1972_v18 = vld [vmem:[#allocation2 + $0x390] sm:$0xff]  ;;  %v1971_v22 = vld [vmem:[#allocation2 + $0x388] sm:$0xff] }
  0x4a   :  { %1263 = vmatpush.bf16.msra.mxu3 %v1953_v19  ;;  %v1980_v19 = vld [vmem:[#allocation2 + $0x3d0] sm:$0xff] }
  0x4b   :  { %1225 = vmatpush.bf16.msra.mxu0 %v1928_v24  ;;  %v1954_v24 = vld [vmem:[#allocation2 + $0x300] sm:$0xff] }
  0x4c   :  { %1238 = vmatpush.bf16.msra.mxu1 %v1936_v25  ;;  %v1962_v25 = vld [vmem:[#allocation2 + $0x340] sm:$0xff] }
  0x4d   :  { %1251 = vmatpush.bf16.msra.mxu2 %v1944_v26  ;;  %v1970_v26 = vld [vmem:[#allocation2 + $0x380] sm:$0xff] }
  0x4e   :  { %1264 = vmatpush.bf16.msra.mxu3 %v1952_v27  ;;  %v1978_v27 = vld [vmem:[#allocation2 + $0x3c0] sm:$0xff] }
  0x4f   :  { %1226 = vmatpush.bf16.msra.mxu0 %v1927_v28  ;;  %v56_v28 = vld.sshfl [vmem:[#allocation1 + $0x20] sm:$0xff pattern:$0x73625140] }
  0x50   :  { %1239 = vmatpush.bf16.msra.mxu1 %v1935_v29  ;;  %v57_v29 = vld.sshfl [vmem:[#allocation1 + $0x28] sm:$0xff pattern:$0x73625140] }
  0x51   :  { %1252 = vmatpush.bf16.msra.mxu2 %v1943_v30  ;;  %v58_v30 = vld.sshfl [vmem:[#allocation1 + $0x30] sm:$0xff pattern:$0x73625140] }
  0x52   :  { %1265 = vmatpush.bf16.msra.mxu3 %v1951_v31  ;;  %v59_v31 = vld.sshfl [vmem:[#allocation1 + $0x38] sm:$0xff pattern:$0x73625140] }
  0x53   :  { %1227 = vmatpush.bf16.msra.mxu0 %v1926_v32  ;;  %v88_v32 = vpack.c.bf16 %v56_v28, %v56_v28 }
  0x54   :  { %1240 = vmatpush.bf16.msra.mxu1 %v1934_v33  ;;  %v89_v33 = vpack.c.bf16 %v57_v29, %v57_v29 }
  0x55   :  { %1253 = vmatpush.bf16.msra.mxu2 %v1942_v34  ;;  %v90_v34 = vpack.c.bf16 %v58_v30, %v58_v30 }
  0x56   :  { %1266 = vmatpush.bf16.msra.mxu3 %v1950_v35  ;;  %v91_v35 = vpack.c.bf16 %v59_v31, %v59_v31 }
  0x57   :  { %1228 = vmatpush.bf16.msra.mxu0 %v1925_v36  ;;  %v1990_v36 = vld [vmem:[%s2106_s2] ss:$0 sm:$0xff]  ;;  %s2046_s2 = smov [#allocation5]  }
  0x58   :  { %1241 = vmatpush.bf16.msra.mxu1 %v1933_v37  ;;  %s1334_s27 = sshll.u32 %s2046_s2, 4  ;;  %s1335_s27 = int_to_ptr.vmem [resolvable:$true] %s1334_s27 }
  0x59   :  { %1254 = vmatpush.bf16.msra.mxu2 %v1941_v38 }
  0x5a   :  { %1267 = vmatpush.bf16.msra.mxu3 %v1949_v39 }
  0x5b   :  { %1229 = vmatpush.bf16.msra.mxu0 %v1924_v40 }
  0x5c   :  { %1242 = vmatpush.bf16.msra.mxu1 %v1932_v41 }
  0x5d   :  { %1255 = vmatpush.bf16.msra.mxu2 %v1940_v42 }
  0x5e   :  { %1268 = vmatpush.bf16.msra.mxu3 %v1948_v43 }
  0x5f   :  { %1230 = vmatpush.bf16.msra.mxu0 %v1923_v44 }
  0x60   :  { %1243 = vmatpush.bf16.msra.mxu1 %v1931_v45 }
  0x61   :  { %1256 = vmatpush.bf16.msra.mxu2 %v1939_v46 }
  0x62   :  { %1269 = vmatpush.bf16.msra.mxu3 %v1947_v47 }
  0x63   :  { %1231 = vmatpush.bf16.msra.mxu0 %v1922_v48 }
  0x64   :  { %1244 = vmatpush.bf16.msra.mxu1 %v1930_v49 }
  0x65   :  { %1257 = vmatpush.bf16.msra.mxu2 %v1938_v50 }
  0x66   :  { %1270 = vmatpush.bf16.msra.mxu3 %v1946_v51  ;;  %1232 = vmatmul.bf16.vlgmr.msra.gmra.mxu0 %v84_v60 }
  0x67   :  { %1276 = vmatpush.bf16.msrb.mxu0 %v1961_v52  ;;  %1245 = vmatmul.bf16.vlgmr.msra.gmra.mxu1 %v85_v62 }
  0x68   :  { %1289 = vmatpush.bf16.msrb.mxu1 %v1969_v53  ;;  %1258 = vmatmul.bf16.vlgmr.msra.gmra.mxu2 %v86_v61 }
  0x69   :  { %1302 = vmatpush.bf16.msrb.mxu2 %v1977_v58  ;;  %1271 = vmatmul.bf16.vlgmr.msra.gmra.mxu3 %v87_v63 }
  0x6a   :  { %1315 = vmatpush.bf16.msrb.mxu3 %v1985_v59 }
  0x6b   :  { %1277 = vmatpush.bf16.msrb.mxu0 %v1960_v0 }
  0x6c   :  { %1290 = vmatpush.bf16.msrb.mxu1 %v1968_v1 }
  0x6d   :  { %1303 = vmatpush.bf16.msrb.mxu2 %v1976_v2 }
  0x6e   :  { %1316 = vmatpush.bf16.msrb.mxu3 %v1984_v3 }
  0x6f   :  { %1278 = vmatpush.bf16.msrb.mxu0 %v1959_v4 }
  0x70   :  { %1291 = vmatpush.bf16.msrb.mxu1 %v1967_v5 }
  0x71   :  { %1304 = vmatpush.bf16.msrb.mxu2 %v1975_v6 }
  0x72   :  { %1317 = vmatpush.bf16.msrb.mxu3 %v1983_v7 }
  0x73   :  { %1279 = vmatpush.bf16.msrb.mxu0 %v1958_v8 }
  0x74   :  { %1292 = vmatpush.bf16.msrb.mxu1 %v1966_v9 }
  0x75   :  { %1305 = vmatpush.bf16.msrb.mxu2 %v1974_v10 }
  0x76   :  { %1318 = vmatpush.bf16.msrb.mxu3 %v1982_v11 }
  0x77   :  { %1280 = vmatpush.bf16.msrb.mxu0 %v1957_v12 }
  0x78   :  { %1293 = vmatpush.bf16.msrb.mxu1 %v1965_v13 }
  0x79   :  { %1306 = vmatpush.bf16.msrb.mxu2 %v1973_v14 }
  0x7a   :  { %1319 = vmatpush.bf16.msrb.mxu3 %v1981_v15 }
  0x7b   :  { %1281 = vmatpush.bf16.msrb.mxu0 %v1956_v16 }
  0x7c   :  { %1294 = vmatpush.bf16.msrb.mxu1 %v1964_v17 }
  0x7d   :  { %1307 = vmatpush.bf16.msrb.mxu2 %v1972_v18 }
  0x7e   :  { %1320 = vmatpush.bf16.msrb.mxu3 %v1980_v19 }
  0x7f   :  { %1282 = vmatpush.bf16.msrb.mxu0 %v1955_v20 }
  0x80   :  { %1295 = vmatpush.bf16.msrb.mxu1 %v1963_v21 }
  0x81   :  { %1308 = vmatpush.bf16.msrb.mxu2 %v1971_v22 }
  0x82   :  { %1321 = vmatpush.bf16.msrb.mxu3 %v1979_v23 }
  0x83   :  { %1283 = vmatpush.bf16.msrb.mxu0 %v1954_v24 }
  0x84   :  { %1296 = vmatpush.bf16.msrb.mxu1 %v1962_v25 }
  0x85   :  { %1309 = vmatpush.bf16.msrb.mxu2 %v1970_v26 }
  0x86   :  { %1322 = vmatpush.bf16.msrb.mxu3 %v1978_v27  ;;  %1284 = vmatmul.bf16.vlgmr.msrb.gmra.mxu0 %v88_v32 }
  0x87   :  { %1297 = vmatmul.bf16.vlgmr.msrb.gmra.mxu1 %v89_v33 }
  0x88   :  { %1310 = vmatmul.bf16.vlgmr.msrb.gmra.mxu2 %v90_v34 }
  0x89   :  { %1323 = vmatmul.bf16.vlgmr.msrb.gmra.mxu3 %v91_v35 }
  0xa3   :  { %v1129_v37 = vpop.f32.mrf.mxu0 }
  0xa4   :  { %v1130_v38 = vadd.f32 %v1990_v36, %v1129_v37  ;;  %v1142_v39 = vpop.f32.mrf.mxu1 }
  0xa6   :  { %v1143_v40 = vadd.f32 %v1142_v39, %v1130_v38 }
  0xab   :  { %v1155_v41 = vpop.f32.mrf.mxu2  ;;  %v1131_v44 = vpop.f32.mrf.mxu0 }
  0xac   :  { %v1156_v42 = vadd.f32 %v1155_v41, %v1143_v40  ;;  %v1168_v43 = vpop.f32.mrf.mxu3  ;;  %v1144_v46 = vpop.f32.mrf.mxu1 }
  0xae   :  { %v1169_v45 = vadd.f32 %v1168_v43, %v1156_v42 }
  0xb3   :  { %v1157_v47 = vpop.f32.mrf.mxu2 }
  0xb4   :  { %v1170_v48 = vpop.f32.mrf.mxu3 }
  0xc3   :  { %v1181_v49 = vpop.f32.mrf.mxu0 }
  0xc4   :  { %v1194_v50 = vpop.f32.mrf.mxu1  ;;  %v1182_v59 = vadd.f32 %v1181_v49, %v1169_v45 }
  0xc6   :  { %v1195_v63 = vadd.f32 %v1194_v50, %v1182_v59 }
  0xcb   :  { %v1207_v51 = vpop.f32.mrf.mxu2  ;;  %v1183_v53 = vpop.f32.mrf.mxu0 }
  0xcc   :  { %v1220_v52 = vpop.f32.mrf.mxu3  ;;  %v1196_v54 = vpop.f32.mrf.mxu1  ;;  %v1208_v1 = vadd.f32 %v1207_v51, %v1195_v63 }
  0xce   :  { %v1221_v4 = vadd.f32 %v1220_v52, %v1208_v1 }
  0xd3   :  { %v1209_v55 = vpop.f32.mrf.mxu2 }
  0xd4   :  { %v1222_v56 = vpop.f32.mrf.mxu3 }
  0xe3   :  { %v1233_v57 = vpop.f32.mrf.mxu0 }
  0xe4   :  { %v1246_v58 = vpop.f32.mrf.mxu1  ;;  %v1234_v5 = vadd.f32 %v1233_v57, %v1221_v4 }
  0xe6   :  { %v1247_v6 = vadd.f32 %v1246_v58, %v1234_v5 }
  0xeb   :  { %v1259_v60 = vpop.f32.mrf.mxu2  ;;  %v1235_v62 = vpop.f32.mrf.mxu0 }
  0xec   :  { %v1272_v61 = vpop.f32.mrf.mxu3  ;;  %v1248_v0 = vpop.f32.mrf.mxu1  ;;  %v1260_v7 = vadd.f32 %v1259_v60, %v1247_v6 }
  0xee   :  { %v1273_v8 = vadd.f32 %v1272_v61, %v1260_v7 }
  0xf3   :  { %v1261_v2 = vpop.f32.mrf.mxu2 }
  0xf4   :  { %v1274_v3 = vpop.f32.mrf.mxu3 }
 0x103   :  { %v1285_v9 = vpop.f32.mrf.mxu0 }
 0x104   :  { %v1298_v10 = vpop.f32.mrf.mxu1  ;;  %v1286_v11 = vadd.f32 %v1285_v9, %v1273_v8 }
 0x106   :  { %v1299_v12 = vadd.f32 %v1298_v10, %v1286_v11 }
 0x10b   :  { %v1311_v13 = vpop.f32.mrf.mxu2  ;;  %v1287_v16 = vpop.f32.mrf.mxu0 }
 0x10c   :  { %v1324_v14 = vpop.f32.mrf.mxu3  ;;  %v1312_v15 = vadd.f32 %v1311_v13, %v1299_v12  ;;  %v1300_v17 = vpop.f32.mrf.mxu1 }
 0x10e   :  { %v1325_v18 = vadd.f32 %v1324_v14, %v1312_v15 }
 0x110   :  { %1328 = vst [vmem:[#allocation5] sm:$0x3] %v1325_v18 }
 0x111   :  { %1339 = dma.vmem_to_hbm [thread:$0]  %s1335_s27, 32, %s1337_s30, [#allocation4]  }
 0x113   :  { %v1313_v19 = vpop.f32.mrf.mxu2 }
 0x114   :  { %v1326_v20 = vpop.f32.mrf.mxu3 }
 0x115   :  { %2041 = dma.done.wait [#allocation4], 32  }
 0x116   :  { %2042 = vsyncadd [#allocation4], 4294967264 }
 0x117   :  { %1344 = vsyncpa [#allocation3], 1 }
 0x118   :  { %1345 = vsyncpa [#allocation4], 1 }

</bundles_post_ra>
